<compile_context>
chip_gen: v6e
topology: v6e:2x2x1
jax: 0.10.0
libtpu: 0.0.40
codegen_flags: <defaults>
</compile_context>

<pallas_src>
import functools

import jax
import jax.numpy as jnp
from jax.experimental import pallas as pl
from jax.experimental.pallas import tpu as pltpu

_LANE = 128
_MAX_W = 8192                    # lane-dense width cap (1024-8192 lanes sweet spot)
_BLOCK_BYTES = 4 * 1024 * 1024   # ~4 MiB per block; double-buffered in (aliased out)
                                 # stays well under the 32 MiB scoped VMEM default


def _copy_kernel(x_ref, o_ref):
    # identity copy of the current (tile_rows, W) tile
    o_ref[...] = x_ref[...]


def _sublane_multiple(dtype):
    # packed dtypes pack along sublanes: 8 (f32), 16 (bf16), 32 (int8/fp8)
    bits = jnp.dtype(dtype).itemsize * 8
    return max(8, 256 // bits)


def _resolve_shape(total, shape):
    # resolve a single -1 like torch.Tensor.view does
    shape = tuple(int(s) for s in shape)
    if -1 in shape:
        known = 1
        for s in shape:
            if s != -1:
                known *= s
        shape = tuple(total // known if s == -1 else s for s in shape)
    return shape


@functools.partial(jax.jit, static_argnames=("shape",))
def pallas_reshape(x, shape):
    """Equivalent of torch.Tensor.view(*shape); copy hot path done in Pallas."""
    total = x.size
    shape = _resolve_shape(total, shape)

    # NOTE: a row-major reshape of a contiguous array is a zero-cost metadata op
    # in XLA, so this branch is the *fast* path, not a degraded fallback.
    if total == 0 or total % _LANE != 0:
        return jnp.reshape(x, shape)

    itemsize = jnp.dtype(x.dtype).itemsize

    # 1) lane-dense width: widest multiple of 128 that divides `total`.
    W = _LANE
    for cand in range(min(_MAX_W, total), _LANE - 1, -_LANE):
        if total % cand == 0:
            W = cand
            break
    rows = total // W

    sub = _sublane_multiple(x.dtype)

    # 2) block rows: target ~_BLOCK_BYTES per block, multiple of the sublane pack.
    if rows < 2 * sub:
        # too small to tile: single block covering the full (rows, W) array
        tile_rows = rows
        grid = 1
    else:
        tile_rows = max(sub, (_BLOCK_BYTES // (W * itemsize)) // sub * sub)
        tile_rows = min(tile_rows, (rows // sub) * sub)
        if tile_rows >= rows:
            # split so both v7x TensorCores get work (grid >= 2)
            tile_rows = max(sub, pl.cdiv(pl.cdiv(rows, 2), sub) * sub)
        grid = pl.cdiv(rows, tile_rows)  # partial last block handled by Pallas

    x2d = jnp.reshape(x, (rows, W))  # row-major flatten (metadata only)

    out2d = pl.pallas_call(
        _copy_kernel,
        out_shape=jax.ShapeDtypeStruct((rows, W), x.dtype),
        grid_spec=pltpu.PrefetchScalarGridSpec(
            num_scalar_prefetch=0,
            grid=(grid,),
            in_specs=[pl.BlockSpec((tile_rows, W), lambda i: (i, 0))],
            out_specs=pl.BlockSpec((tile_rows, W), lambda i: (i, 0)),
        ),
        # output aliases input: no second HBM allocation for the copy target
        input_output_aliases={0: 0},
        cost_estimate=pl.CostEstimate(
            flops=0, transcendentals=0, bytes_accessed=2 * total * itemsize),
        compiler_params=pltpu.CompilerParams(
            dimension_semantics=("parallel",),      # megacore split on v7x
            vmem_limit_bytes=32 * 1024 * 1024,
        ),
    )(x2d)
    return jnp.reshape(out2d, shape)


class Reshape:
    """JAX/Pallas mirror of the PyTorch Reshape module (forward == .view)."""

    def __init__(self, *args):
        self.shape = args

    def __repr__(self):
        return f"{self.__class__.__name__}{self.shape}"

    def __call__(self, x):
        return pallas_reshape(x, tuple(self.shape))


if __name__ == "__main__":
    key = jax.random.PRNGKey(0)

    # NCHW input, consistent with typical conv-feature flattening usage
    x = jax.random.normal(key, (2, 4, 16, 16), dtype=jnp.float32)
    ref = jnp.reshape(x, (2, -1))

    mod = Reshape(2, -1)
    out = mod(x)
    jax.block_until_ready(out)

    assert out.shape == (2, 4 * 16 * 16), out.shape
    assert out.dtype == x.dtype
    assert bool(jnp.array_equal(out, ref))

    # also exercise the multi-block (grid >= 2, lane-dense W) path
    x2 = jax.random.normal(key, (8, 16, 32, 32), dtype=jnp.float32)
    out2 = Reshape(-1, 32 * 32)(x2)
    jax.block_until_ready(out2)
    assert out2.shape == (8 * 16, 32 * 32)
    assert bool(jnp.array_equal(out2, jnp.reshape(x2, (-1, 32 * 32))))

    print("KERNEL_OK")
</pallas_src>

<mosaic_0001>
module attributes {stable_mosaic.version = 11 : i64} {
  func.func @_copy_kernel(%arg0: i32, %arg1: memref<1x2048xf32, #tpu.memory_space<vmem>>, %arg2: memref<1x2048xf32, #tpu.memory_space<vmem>>) attributes {dimension_semantics = [#tpu.dimension_semantics<parallel>], iteration_bounds = array<i64: 1>, scalar_prefetch = 0 : i64, scratch_operands = 0 : i64, tpu.core_type = #tpu.core_type<tc>, window_params = [{transform_indices = @transform_0, window_bounds = array<i64: 1, 2048>}, {transform_indices = @transform_1, window_bounds = array<i64: 1, 2048>}]} {
    %c0 = arith.constant 0 : index
    %c0_0 = arith.constant 0 : index
    %0 = vector.load %arg1[%c0, %c0_0] : memref<1x2048xf32, #tpu.memory_space<vmem>>, vector<1x2048xf32>
    %c0_1 = arith.constant 0 : index
    %c0_2 = arith.constant 0 : index
    %1 = vector.load %arg2[%c0_1, %c0_2] : memref<1x2048xf32, #tpu.memory_space<vmem>>, vector<1x2048xf32>
    tpu.vector_store %arg2[%c0_1, %c0_2], %0 {strides = array<i32>} : memref<1x2048xf32, #tpu.memory_space<vmem>>, vector<1x2048xf32>,
    return
  }
  func.func @transform_0(%arg0: i32) -> (i32, i32) {
    %c0_i32 = arith.constant 0 : i32
    %c0_i32_0 = arith.constant 0 : i32
    return %arg0, %c0_i32 : i32, i32
  }
  func.func @transform_1(%arg0: i32) -> (i32, i32) {
    %c0_i32 = arith.constant 0 : i32
    %c0_i32_0 = arith.constant 0 : i32
    return %arg0, %c0_i32 : i32, i32
  }
}

</mosaic_0001>

<bundles_post_ra>
// kernel: pallas_reshape.1
= control target key start
LH: loop header
LB: loop body
LE: loop exit
PB: predicated region body
PF: predicated region fallthrough
CT: control target
= control target key end

     0   :  { %s38_s0 = inlined_call_operand.vmem [shape: f32[1,2048], index: 0, kind: input, shape index: {}, may-alias: {0,1}]   ;;  %s39_s1 = inlined_call_operand.vmem [shape: f32[1,2048], index: 1, kind: output, shape index: {}, may-alias: {0,1}]  }
   0x1   :  { %v8_v0 = vld [vmem:[%s38_s0] sm:$0xff]  ;;  %v9_v1 = vld [vmem:[%s38_s0 + $0x8] sm:$0xff] }
   0x2   :  { %10 = vst [vmem:[%s39_s1] sm:$0xff] %v8_v0  ;;  %11 = vst [vmem:[%s39_s1 + $0x8] sm:$0xff] %v9_v1 }

</bundles_post_ra>
